<compile_context>
chip_gen: v7x
topology: tpu7x:2x2x1
jax: 0.10.0
libtpu: 0.0.40
codegen_flags: <defaults>
</compile_context>

<pallas_src>
import jax
import jax.numpy as jnp
from jax.experimental import pallas as pl
from jax.experimental.pallas import tpu as pltpu

# Fixed Sobel taps (only used by the pure-JAX reference; the kernel uses the
# separable factorization of the same filters).
_SOBEL_X = ((-1.0, 0.0, 1.0), (-2.0, 0.0, 2.0), (-1.0, 0.0, 1.0))
_SOBEL_Y = ((1.0, 2.0, 1.0), (0.0, 0.0, 0.0), (-1.0, -2.0, -1.0))

_TARGET_TILE_BYTES = 1 << 20  # ~1 MiB center block target (see header comment).


def _sobel_kernel(xc_ref, xa_ref, xb_ref, o_ref, pad_ref):
    """One (plane-batch, row-tile) grid step.

    xc_ref : (Bt, TH, W)      center rows of the tile (unpadded input).
    xa_ref : (Bt, HBa, W)     rows just above the tile; only its LAST row is used.
    xb_ref : (Bt, HBb, W)     rows just below the tile; only its FIRST row is used.
    o_ref  : (Bt, TH, W)      gradient-magnitude output.
    pad_ref: (Bt, TH+2, W+2)  f32 VMEM scratch holding the zero-padded tile.
    """
    f32 = jnp.float32
    bt, th, w = o_ref.shape
    hba = xa_ref.shape[1]

    r = pl.program_id(1)
    is_first = r == 0
    is_last = r == pl.num_programs(1) - 1

    # --- assemble the zero-padded (TH+2, W+2) working tile in VMEM ------------
    # (this synthesizes conv2d's padding=1 in-kernel; no padded copy ever hits HBM)
    pad_ref[:, 1:th + 1, 1:w + 1] = xc_ref[...].astype(f32)
    row_above = xa_ref[:, hba - 1:hba, :].astype(f32)   # global row r*TH - 1
    row_below = xb_ref[:, 0:1, :].astype(f32)           # global row (r+1)*TH
    pad_ref[:, 0:1, 1:w + 1] = jnp.where(is_first, 0.0, row_above)
    pad_ref[:, th + 1:th + 2, 1:w + 1] = jnp.where(is_last, 0.0, row_below)
    pad_ref[:, :, 0:1] = jnp.zeros((bt, th + 2, 1), f32)          # left zero column
    pad_ref[:, :, w + 1:w + 2] = jnp.zeros((bt, th + 2, 1), f32)  # right zero column

    xp = pad_ref[...]                                    # (Bt, TH+2, W+2)

    # --- separable Sobel (pure VPU work; zero taps never materialize) ---------
    left, mid, right = xp[:, :, 0:w], xp[:, :, 1:w + 1], xp[:, :, 2:w + 2]
    hx = right - left                    # horizontal [-1, 0, 1]
    hy = (left + right) + (mid + mid)    # horizontal [ 1, 2, 1]   (x2 == add)

    up_x, mid_x, dn_x = hx[:, 0:th], hx[:, 1:th + 1], hx[:, 2:th + 2]
    ex = (up_x + dn_x) + (mid_x + mid_x)          # vertical [1, 2, 1]
    ey = hy[:, 0:th] - hy[:, 2:th + 2]            # vertical [1, 0, -1]

    o_ref[...] = jnp.sqrt(ex * ex + ey * ey).astype(o_ref.dtype)


def _choose_tiling(nc, h, w):
    """Pick (plane_batch Bt, row_tile TH) for a (nc, h, w) stack of planes."""
    plane_bytes = h * w * 4
    if plane_bytes <= _TARGET_TILE_BYTES:
        # Small planes: batch several per grid step; no row tiling needed.
        cap = max(1, _TARGET_TILE_BYTES // plane_bytes)
        bt = max(d for d in range(1, nc + 1) if nc % d == 0 and d <= cap)
        return bt, h
    # Large planes: one plane per step, tile rows (multiple of 8 dividing H).
    th = h
    if h % 8 == 0:
        cands = [t for t in range(8, h + 1, 8)
                 if h % t == 0 and t * w * 4 <= _TARGET_TILE_BYTES]
        if cands:
            th = max(cands)
    return 1, th


def sobel_filter(img, *, row_tile=None, plane_batch=None):
    """JAX/Pallas equivalent of SobelFilter.forward for NCHW input with C == 1."""
    n, c, h, w = img.shape
    assert c == 1, "SobelFilter uses a (1, 1, 3, 3) kernel: expects a single channel."
    nc = n * c
    x = img.reshape(nc, h, w)

    bt, th = _choose_tiling(nc, h, w)
    if plane_batch is not None:
        assert nc % plane_batch == 0, "plane_batch must divide N*C"
        bt = plane_batch
    if row_tile is not None:
        th = min(row_tile, h)
    if th != h:
        assert h % th == 0 and th % 8 == 0, \
            "row tiles must be a multiple of 8 that divides H"

    nb = nc // bt            # plane-batch grid extent
    nr = h // th             # row-tile grid extent

    if nr > 1:
        # Halo rows come from 8-row blocks of the same input adjacent to the tile
        # (extra ~16 rows read per TH-row tile -> a few % of the HBM traffic).
        hb = 8
        n_hb = h // hb
        halo = x
        above_spec = pl.BlockSpec(
            (bt, hb, w),
            lambda b, r: (b, jnp.maximum(r * (th // hb) - 1, 0), 0))
        below_spec = pl.BlockSpec(
            (bt, hb, w),
            lambda b, r: (b, jnp.minimum((r + 1) * (th // hb), n_hb - 1), 0))
    else:
        # Single row tile: the halo contributions are fully masked in-kernel, so
        # feed a tiny zero array instead of re-reading the image.
        halo = jnp.zeros((nc, 1, w), x.dtype)
        above_spec = pl.BlockSpec((bt, 1, w), lambda b, r: (b, 0, 0))
        below_spec = pl.BlockSpec((bt, 1, w), lambda b, r: (b, 0, 0))

    out = pl.pallas_call(
        _sobel_kernel,
        out_shape=jax.ShapeDtypeStruct((nc, h, w), img.dtype),
        grid=(nb, nr),
        in_specs=[
            pl.BlockSpec((bt, th, w), lambda b, r: (b, r, 0)),
            above_spec,
            below_spec,
        ],
        out_specs=pl.BlockSpec((bt, th, w), lambda b, r: (b, r, 0)),
        scratch_shapes=[pltpu.VMEM((bt, th + 2, w + 2), jnp.float32)],
        compiler_params=pltpu.CompilerParams(
            # Both grid axes are independent -> both v7x TensorCores / megacore
            # get work even when N*C == 1.
            dimension_semantics=("parallel", "parallel"),
            # Above v5e's 16 MiB default scoped limit, below v7x's 64 MiB physical.
            vmem_limit_bytes=32 * 1024 * 1024,
        ),
        cost_estimate=pl.CostEstimate(
            flops=14 * nc * h * w,
            transcendentals=nc * h * w,
            bytes_accessed=2 * 4 * nc * h * w,
        ),
    )(x, halo, halo)
    return out.reshape(n, c, h, w)


def _sobel_reference(img):
    """Pure-JAX reference (explicit cross-correlation, matching F.conv2d)."""
    n, c, h, w = img.shape
    xp = jnp.pad(img[:, 0].astype(jnp.float32), ((0, 0), (1, 1), (1, 1)))
    ex = jnp.zeros((n, h, w), jnp.float32)
    ey = jnp.zeros((n, h, w), jnp.float32)
    for dh in range(3):
        for dw in range(3):
            win = xp[:, dh:dh + h, dw:dw + w]
            ex = ex + _SOBEL_X[dh][dw] * win
            ey = ey + _SOBEL_Y[dh][dw] * win
    return jnp.sqrt(ex * ex + ey * ey)[:, None].astype(img.dtype)


if __name__ == "__main__":
    key = jax.random.PRNGKey(0)
    k1, k2 = jax.random.split(key)

    # Case 1: module-sized input (batch=2, 1 channel, 16x16): single row tile,
    # both planes batched into one grid step.
    img1 = jax.random.normal(k1, (2, 1, 16, 16), jnp.float32)
    y1 = jax.block_until_ready(jax.jit(sobel_filter)(img1))
    assert y1.shape == img1.shape and y1.dtype == img1.dtype
    r1 = _sobel_reference(img1)
    assert jnp.allclose(y1, r1, atol=1e-5, rtol=1e-5), float(jnp.max(jnp.abs(y1 - r1)))

    # Case 2: same input through the row-tiled path (2 row tiles of 8 rows),
    # exercising the first/last-tile halo masking and the halo exchange.
    y2 = jax.block_until_ready(jax.jit(lambda a: sobel_filter(a, row_tile=8))(img1))
    assert jnp.allclose(y2, r1, atol=1e-5, rtol=1e-5), float(jnp.max(jnp.abs(y2 - r1)))

    # Case 3: a lane-dense plane with interior row tiles (4 tiles of 16 rows)
    # on the 2-D parallel grid.
    img3 = jax.random.normal(k2, (1, 1, 64, 128), jnp.float32)
    y3 = jax.block_until_ready(jax.jit(lambda a: sobel_filter(a, row_tile=16))(img3))
    r3 = _sobel_reference(img3)
    assert jnp.allclose(y3, r3, atol=1e-5, rtol=1e-5), float(jnp.max(jnp.abs(y3 - r3)))

    print("KERNEL_OK")
</pallas_src>

<mosaic_0001>
module attributes {stable_mosaic.version = 11 : i64} {
  func.func @_sobel_kernel(%arg0: i32, %arg1: i32, %arg2: memref<2x16x16xf32, #tpu.memory_space<vmem>>, %arg3: memref<2x1x16xf32, #tpu.memory_space<vmem>>, %arg4: memref<2x1x16xf32, #tpu.memory_space<vmem>>, %arg5: memref<2x16x16xf32, #tpu.memory_space<vmem>>, %arg6: memref<2x18x18xf32, #tpu.memory_space<vmem>>) attributes {dimension_semantics = [#tpu.dimension_semantics<parallel>, #tpu.dimension_semantics<parallel>], iteration_bounds = array<i64: 1, 1>, scalar_prefetch = 0 : i64, scratch_operands = 1 : i64, tpu.core_type = #tpu.core_type<tc>, window_params = [{transform_indices = @transform_0, window_bounds = array<i64: 2, 16, 16>}, {transform_indices = @transform_1, window_bounds = array<i64: 2, 1, 16>}, {transform_indices = @transform_2, window_bounds = array<i64: 2, 1, 16>}, {transform_indices = @transform_3, window_bounds = array<i64: 2, 16, 16>}]} {
    %c0_i32 = arith.constant 0 : i32
    %0 = arith.cmpi eq, %arg1, %c0_i32 : i32
    %c0_i32_0 = arith.constant 0 : i32
    %1 = arith.cmpi eq, %arg1, %c0_i32_0 : i32
    %c0 = arith.constant 0 : index
    %c0_1 = arith.constant 0 : index
    %c0_2 = arith.constant 0 : index
    %2 = vector.load %arg2[%c0, %c0_1, %c0_2] : memref<2x16x16xf32, #tpu.memory_space<vmem>>, vector<2x16x16xf32>
    %c0_3 = arith.constant 0 : index
    %c1 = arith.constant 1 : index
    %c1_4 = arith.constant 1 : index
    %3 = vector.load %arg6[%c0_3, %c1, %c1_4] : memref<2x18x18xf32, #tpu.memory_space<vmem>>, vector<2x16x16xf32>
    tpu.vector_store %arg6[%c0_3, %c1, %c1_4], %2 {strides = array<i32>} : memref<2x18x18xf32, #tpu.memory_space<vmem>>, vector<2x16x16xf32>,
    %c0_5 = arith.constant 0 : index
    %c0_6 = arith.constant 0 : index
    %c0_7 = arith.constant 0 : index
    %4 = vector.load %arg3[%c0_5, %c0_6, %c0_7] : memref<2x1x16xf32, #tpu.memory_space<vmem>>, vector<2x1x16xf32>
    %c0_8 = arith.constant 0 : index
    %c0_9 = arith.constant 0 : index
    %c0_10 = arith.constant 0 : index
    %5 = vector.load %arg4[%c0_8, %c0_9, %c0_10] : memref<2x1x16xf32, #tpu.memory_space<vmem>>, vector<2x1x16xf32>
    %cst = arith.constant 0.000000e+00 : f32
    %6 = vector.broadcast %cst : f32 to vector<2x1x16xf32>
    %7 = arith.select %0, %6, %4 : vector<2x1x16xf32>
    %c0_11 = arith.constant 0 : index
    %c0_12 = arith.constant 0 : index
    %c1_13 = arith.constant 1 : index
    %8 = vector.load %arg6[%c0_11, %c0_12, %c1_13] : memref<2x18x18xf32, #tpu.memory_space<vmem>>, vector<2x1x16xf32>
    tpu.vector_store %arg6[%c0_11, %c0_12, %c1_13], %7 {strides = array<i32>} : memref<2x18x18xf32, #tpu.memory_space<vmem>>, vector<2x1x16xf32>,
    %cst_14 = arith.constant 0.000000e+00 : f32
    %9 = vector.broadcast %cst_14 : f32 to vector<2x1x16xf32>
    %10 = arith.select %1, %9, %5 : vector<2x1x16xf32>
    %c0_15 = arith.constant 0 : index
    %c17 = arith.constant 17 : index
    %c1_16 = arith.constant 1 : index
    %11 = vector.load %arg6[%c0_15, %c17, %c1_16] : memref<2x18x18xf32, #tpu.memory_space<vmem>>, vector<2x1x16xf32>
    tpu.vector_store %arg6[%c0_15, %c17, %c1_16], %10 {strides = array<i32>} : memref<2x18x18xf32, #tpu.memory_space<vmem>>, vector<2x1x16xf32>,
    %cst_17 = arith.constant 0.000000e+00 : f32
    %12 = vector.broadcast %cst_17 : f32 to vector<2x18x1xf32>
    %c0_18 = arith.constant 0 : index
    %c0_19 = arith.constant 0 : index
    %c0_20 = arith.constant 0 : index
    %13 = vector.load %arg6[%c0_18, %c0_19, %c0_20] : memref<2x18x18xf32, #tpu.memory_space<vmem>>, vector<2x18x1xf32>
    tpu.vector_store %arg6[%c0_18, %c0_19, %c0_20], %12 {strides = array<i32>} : memref<2x18x18xf32, #tpu.memory_space<vmem>>, vector<2x18x1xf32>,
    %cst_21 = arith.constant 0.000000e+00 : f32
    %14 = vector.broadcast %cst_21 : f32 to vector<2x18x1xf32>
    %c0_22 = arith.constant 0 : index
    %c0_23 = arith.constant 0 : index
    %c17_24 = arith.constant 17 : index
    %15 = vector.load %arg6[%c0_22, %c0_23, %c17_24] : memref<2x18x18xf32, #tpu.memory_space<vmem>>, vector<2x18x1xf32>
    tpu.vector_store %arg6[%c0_22, %c0_23, %c17_24], %14 {strides = array<i32>} : memref<2x18x18xf32, #tpu.memory_space<vmem>>, vector<2x18x1xf32>,
    %c0_25 = arith.constant 0 : index
    %c0_26 = arith.constant 0 : index
    %c0_27 = arith.constant 0 : index
    %16 = vector.load %arg6[%c0_25, %c0_26, %c0_27] : memref<2x18x18xf32, #tpu.memory_space<vmem>>, vector<2x18x18xf32>
    %17 = vector.extract_strided_slice %16 {offsets = [0, 0, 0], sizes = [2, 18, 16], strides = [1, 1, 1]} : vector<2x18x18xf32> to vector<2x18x16xf32>
    %18 = vector.extract_strided_slice %16 {offsets = [0, 0, 1], sizes = [2, 18, 16], strides = [1, 1, 1]} : vector<2x18x18xf32> to vector<2x18x16xf32>
    %19 = vector.extract_strided_slice %16 {offsets = [0, 0, 2], sizes = [2, 18, 16], strides = [1, 1, 1]} : vector<2x18x18xf32> to vector<2x18x16xf32>
    %20 = arith.subf %19, %17 : vector<2x18x16xf32>
    %21 = arith.addf %17, %19 : vector<2x18x16xf32>
    %22 = arith.addf %18, %18 : vector<2x18x16xf32>
    %23 = arith.addf %21, %22 : vector<2x18x16xf32>
    %24 = vector.extract_strided_slice %20 {offsets = [0, 0, 0], sizes = [2, 16, 16], strides = [1, 1, 1]} : vector<2x18x16xf32> to vector<2x16x16xf32>
    %25 = vector.extract_strided_slice %20 {offsets = [0, 1, 0], sizes = [2, 16, 16], strides = [1, 1, 1]} : vector<2x18x16xf32> to vector<2x16x16xf32>
    %26 = vector.extract_strided_slice %20 {offsets = [0, 2, 0], sizes = [2, 16, 16], strides = [1, 1, 1]} : vector<2x18x16xf32> to vector<2x16x16xf32>
    %27 = arith.addf %24, %26 : vector<2x16x16xf32>
    %28 = arith.addf %25, %25 : vector<2x16x16xf32>
    %29 = arith.addf %27, %28 : vector<2x16x16xf32>
    %30 = vector.extract_strided_slice %23 {offsets = [0, 0, 0], sizes = [2, 16, 16], strides = [1, 1, 1]} : vector<2x18x16xf32> to vector<2x16x16xf32>
    %31 = vector.extract_strided_slice %23 {offsets = [0, 2, 0], sizes = [2, 16, 16], strides = [1, 1, 1]} : vector<2x18x16xf32> to vector<2x16x16xf32>
    %32 = arith.subf %30, %31 : vector<2x16x16xf32>
    %33 = arith.mulf %29, %29 : vector<2x16x16xf32>
    %34 = arith.mulf %32, %32 : vector<2x16x16xf32>
    %35 = arith.addf %33, %34 : vector<2x16x16xf32>
    %36 = math.sqrt %35 : vector<2x16x16xf32>
    %c0_28 = arith.constant 0 : index
    %c0_29 = arith.constant 0 : index
    %c0_30 = arith.constant 0 : index
    %37 = vector.load %arg5[%c0_28, %c0_29, %c0_30] : memref<2x16x16xf32, #tpu.memory_space<vmem>>, vector<2x16x16xf32>
    tpu.vector_store %arg5[%c0_28, %c0_29, %c0_30], %36 {strides = array<i32>} : memref<2x16x16xf32, #tpu.memory_space<vmem>>, vector<2x16x16xf32>,
    return
  }
  func.func @transform_0(%arg0: i32, %arg1: i32) -> (i32, i32, i32) {
    %c0_i32 = arith.constant 0 : i32
    %c0_i32_0 = arith.constant 0 : i32
    return %arg0, %arg1, %c0_i32 : i32, i32, i32
  }
  func.func @transform_1(%arg0: i32, %arg1: i32) -> (i32, i32, i32) {
    %c0_i32 = arith.constant 0 : i32
    %c0_i32_0 = arith.constant 0 : i32
    %c0_i32_1 = arith.constant 0 : i32
    return %arg0, %c0_i32, %c0_i32_0 : i32, i32, i32
  }
  func.func @transform_2(%arg0: i32, %arg1: i32) -> (i32, i32, i32) {
    %c0_i32 = arith.constant 0 : i32
    %c0_i32_0 = arith.constant 0 : i32
    %c0_i32_1 = arith.constant 0 : i32
    return %arg0, %c0_i32, %c0_i32_0 : i32, i32, i32
  }
  func.func @transform_3(%arg0: i32, %arg1: i32) -> (i32, i32, i32) {
    %c0_i32 = arith.constant 0 : i32
    %c0_i32_0 = arith.constant 0 : i32
    return %arg0, %arg1, %c0_i32 : i32, i32, i32
  }
}

</mosaic_0001>

<bundles_post_ra>
// kernel: sobel_filter.1
= control target key start
LH: loop header
LB: loop body
LE: loop exit
PB: predicated region body
PF: predicated region fallthrough
CT: control target
= control target key end

     0   :  { %8 = vsyncpa [#allocation4], 0  ;;  %s611_s0 = inlined_call_operand.hbm [shape: f32[2,16,16], index: 0, kind: input, shape index: {}]   ;;  %s612_s1 = inlined_call_operand.vmem [shape: f32[2,1,16], index: 1, kind: input, shape index: {}, may-alias: {1,2}]   ;;  %s613_s2 = inlined_call_operand.vmem [shape: f32[2,1,16], index: 2, kind: input, shape index: {}, may-alias: {1,2}]   ;;  %s614_s3 = inlined_call_operand.hbm [shape: f32[2,16,16], index: 3, kind: output, shape index: {}]  }
   0x1   :  { %9 = vsyncpa [#allocation5], 0  ;;  %s464_s12 = smov [#allocation3]   ;;  %s416_s16 = scalar_lea.hbm %s611_s0, 512 }
   0x2   :  { %s15_s13 = sshll.u32 %s464_s12, 4  ;;  %p417_p0 = scmp.ne.s32.totalorder %s611_s0, %s416_s16  ;;  %s16_s13 = int_to_ptr.vmem [resolvable:$true] %s15_s13 }
   0x3   :  { %p420_p1 = scmp.lt.u32.totalorder %s416_s16, %s611_s0 }
   0x5   :  { %p422_p2 = pnand %p420_p1, %p417_p0 }
   0x7   :  { %425 = shalt.err (!%p422_p2)
}
   0x8   :  { %s426_s2 = scalar_lea.vmem %s16_s13, 512  ;;  %p431_p4 = scmp.lt.s32.totalorder %s16_s13, %s16_s13 }
   0x9   :  { %p427_p3 = scmp.ne.s32.totalorder %s16_s13, %s426_s2  ;;  %p432_p5 = scmp.lt.s32.totalorder %s426_s2, %s426_s2 }
   0xb   :  { %p433_p6 = por %p432_p5, %p431_p4 }
   0xd   :  { %p434_p7 = pnand %p433_p6, %p427_p3 }
   0xf   :  { %437 = shalt.err (!%p434_p7)
}
  0x10   :  { %s465_s20 = smov 128   ;;  %s466_s21 = smov 8  }
  0x11   :  { %21 = dma.hbm_to_vmem [thread:$0]  %s611_s0, 512, %s16_s13, [#allocation4], %s465_s20, %s465_s20, %s466_s21  }
  0x12   :  { %460 = dma.done.wait [#allocation4], 512  }
  0x13   :  { %461 = vsyncadd [#allocation4], 4294966784  ;;  %v66_v0 = vlaneseq  ;;  %v30_v3 = vld [vmem:[#allocation3] sm:$0xff]  ;;  %v32_v4 = vld [vmem:[#allocation3 + $0x10] sm:$0xff]  ;;  %s467_s24 = smov 1   ;;  %v468_v5 = vmov 0.0  }
  0x14   :  { %38 = vrot.lane.b32.xlu0 %v30_v3, %s467_s24  ;;  %42 = vrot.lane.b32.xlu1 %v32_v4, %s467_s24  ;;  %v31_v7 = vld [vmem:[#allocation3 + $0x8] sm:$0xff]  ;;  %v33_v8 = vld [vmem:[#allocation3 + $0x18] sm:$0xff]  ;;  %vm50_vm0 = vcmask 138248   ;;  %vm103_vm1 = vcmask 7168   ;;  %vm111_vm2 = vcmask 146568   ;;  %vm80_vm3 = vcmask 131080  }
  0x15   :  { %v67_v1 = vshrl.u32 %v66_v0, 7  ;;  %vm106_vm4 = vcmask 1024   ;;  %vm114_vm5 = vcmask 140424   ;;  %s469_s0 = smov 126   ;;  %s470_s25 = smov 127   ;;  %vm221_vm6 = vcmask 1045504  }
  0x16   :  { %s471_s26 = smov 2   ;;  %vm252_vm7 = vcmask 1046528   ;;  %s472_s27 = smov [#allocation6]  }
  0x17   :  { %v68_v2 = vsub.s32 0, %v67_v1  ;;  %s377_s28 = sshll.u32 %s472_s27, 4  ;;  %s378_s28 = int_to_ptr.vmem [resolvable:$true] %s377_s28 }
  0x18   :  { %40 = vrot.lane.b32.xlu0 %v31_v7, %s467_s24  ;;  %44 = vrot.lane.b32.xlu1 %v33_v8, %s467_s24  ;;  %s438_s29 = scalar_lea.vmem %s378_s28, 512  ;;  %p443_p9 = scmp.lt.s32.totalorder %s378_s28, %s378_s28 }
  0x19   :  { %v69_v6 = vrot.slane %v468_v5, %v68_v2  ;;  %p439_p8 = scmp.ne.s32.totalorder %s378_s28, %s438_s29  ;;  %p444_p10 = scmp.lt.s32.totalorder %s438_s29, %s438_s29 }
  0x1b   :  { %v398_v9 = vpack.i.bf16 %v69_v6, %v69_v6  ;;  %p445_p11 = por %p444_p10, %p443_p9 }
  0x1d   :  { %399 = vrot.lane.b32.xlu0 %v398_v9, %s467_s24  ;;  %404 = vrot.lane.b32.xlu1 %v398_v9, %s467_s24  ;;  %p446_p12 = pnand %p445_p11, %p439_p8 }
  0x86   :  { %v39_v10 = vpop.permute.xlu0 %38  ;;  %v43_v11 = vpop.permute.xlu1 %42 }
  0x87   :  { %51 = vst.msk [vmem:[#allocation2 + $0x1] sm:$0xff] %vm50_vm0, %v39_v10  ;;  %53 = vst.msk [vmem:[#allocation2 + $0x19] sm:$0xff] %vm50_vm0, %v43_v11 }
  0x8a   :  { %v41_v12 = vpop.permute.xlu0 %40  ;;  %v45_v13 = vpop.permute.xlu1 %44 }
  0x8b   :  { %52 = vst.msk [vmem:[#allocation2 + $0x9] sm:$0xff] %vm50_vm0, %v41_v12  ;;  %54 = vst.msk [vmem:[#allocation2 + $0x21] sm:$0xff] %vm50_vm0, %v45_v13  ;;  %vm367_vm0 = vcmask 130048  }
  0x8c   :  { %105 = vst.msk [vmem:[#allocation2 + $0x8] sm:$0xff] %vm103_vm1, %v468_v5  ;;  %109 = vst.msk [vmem:[#allocation2 + $0x20] sm:$0xff] %vm103_vm1, %v468_v5 }
  0x8d   :  { %113 = vst.msk [vmem:[#allocation2 + $0x8] sm:$0xff] %vm111_vm2, %v468_v5  ;;  %117 = vst.msk [vmem:[#allocation2 + $0x20] sm:$0xff] %vm111_vm2, %v468_v5 }
  0x8f   :  { %v400_v14 = vpop.permute.xlu0 %399  ;;  %v405_v15 = vpop.permute.xlu1 %404 }
  0x90   :  { %v402_v16 = vunpack.i.h.bf16 %v400_v14  ;;  %v401_v17 = vunpack.i.l.bf16 %v400_v14  ;;  %v407_v18 = vunpack.i.h.bf16 %v405_v15  ;;  %v406_v19 = vunpack.i.l.bf16 %v405_v15 }
  0x92   :  { %82 = vst.msk [vmem:[#allocation2 + $0x18] sm:$0x1] %vm80_vm3, %v402_v16  ;;  %81 = vst.msk [vmem:[#allocation2] sm:$0x1] %vm80_vm3, %v401_v17 }
  0x93   :  { %102 = vst.msk [vmem:[#allocation2 + $0x29] sm:$0x1] %vm80_vm3, %v407_v18  ;;  %101 = vst.msk [vmem:[#allocation2 + $0x11] sm:$0x1] %vm80_vm3, %v406_v19 }
  0x94   :  { %108 = vst.msk [vmem:[#allocation2 + $0x18] sm:$0xff] %vm103_vm1, %v468_v5  ;;  %104 = vst.msk [vmem:[#allocation2] sm:$0xff] %vm103_vm1, %v468_v5  ;;  %v516_v20 = vld [vmem:[#allocation2 + $0x8] sm:$0xff]  ;;  %v538_v26 = vld [vmem:[#allocation2 + $0x20] sm:$0xff] }
  0x95   :  { %110 = vst.msk [vmem:[#allocation2 + $0x28] sm:$0x3] %vm106_vm4, %v468_v5  ;;  %107 = vst.msk [vmem:[#allocation2 + $0x10] sm:$0x3] %vm106_vm4, %v468_v5  ;;  %157 = vrot.lane.b32.xlu1 %v516_v20, %s469_s0  ;;  %v180_v25 = vadd.f32 %v516_v20, %v516_v20  ;;  %v183_v31 = vadd.f32 %v538_v26, %v538_v26 }
  0x96   :  { %116 = vst.msk [vmem:[#allocation2 + $0x18] sm:$0xff] %vm111_vm2, %v468_v5  ;;  %112 = vst.msk [vmem:[#allocation2] sm:$0xff] %vm111_vm2, %v468_v5 }
  0x97   :  { %118 = vst.msk [vmem:[#allocation2 + $0x28] sm:$0x3] %vm114_vm5, %v468_v5  ;;  %115 = vst.msk [vmem:[#allocation2 + $0x10] sm:$0x3] %vm114_vm5, %v468_v5 }
  0x9d   :  { %v520_v21 = vld [vmem:[#allocation2 + $0x18] sm:$0xff]  ;;  %v522_v22 = vld [vmem:[#allocation2] sm:$0xff] }
  0x9e   :  { %161 = vrot.lane.b32.xlu1 %v520_v21, %s469_s0  ;;  %155 = vrot.lane.b32.xlu0 %v522_v22, %s469_s0  ;;  %v528_v23 = vld [vmem:[#allocation2 + $0x28] sm:$0x3]  ;;  %v530_v24 = vld [vmem:[#allocation2 + $0x10] sm:$0x3]  ;;  %v182_v27 = vadd.f32 %v520_v21, %v520_v21  ;;  %v179_v28 = vadd.f32 %v522_v22, %v522_v22 }
  0x9f   :  { %v184_v29 = vadd.f32 %v528_v23, %v528_v23  ;;  %v181_v30 = vadd.f32 %v530_v24, %v530_v24 }
  0xa2   :  { %165 = vrot.lane.b32.xlu1 %v528_v23, %s469_s0  ;;  %159 = vrot.lane.b32.xlu0 %v530_v24, %s469_s0 }
  0xa6   :  { %193 = vrot.lane.b32.xlu1 %v180_v25, %s470_s25  ;;  %163 = vrot.lane.b32.xlu0 %v538_v26, %s469_s0 }
  0xaa   :  { %197 = vrot.lane.b32.xlu1 %v182_v27, %s470_s25  ;;  %191 = vrot.lane.b32.xlu0 %v179_v28, %s470_s25 }
  0xae   :  { %201 = vrot.lane.b32.xlu1 %v184_v29, %s470_s25  ;;  %195 = vrot.lane.b32.xlu0 %v181_v30, %s470_s25 }
  0xb2   :  { %199 = vrot.lane.b32.xlu0 %v183_v31, %s470_s25  ;;  %133 = vrot.lane.b32.xlu1 %v516_v20, %s471_s26 }
  0xb6   :  { %131 = vrot.lane.b32.xlu0 %v522_v22, %s471_s26  ;;  %137 = vrot.lane.b32.xlu1 %v520_v21, %s471_s26 }
  0xba   :  { %135 = vrot.lane.b32.xlu0 %v530_v24, %s471_s26  ;;  %141 = vrot.lane.b32.xlu1 %v528_v23, %s471_s26 }
  0xbe   :  { %139 = vrot.lane.b32.xlu0 %v538_v26, %s471_s26 }
 0x107   :  { %v158_v32 = vpop.permute.xlu1 %157 }
 0x108   :  { %v174_v39 = vadd.f32 %v158_v32, %v516_v20 }
 0x110   :  { %v162_v33 = vpop.permute.xlu1 %161  ;;  %v156_v34 = vpop.permute.xlu0 %155 }
 0x111   :  { %v173_v40 = vadd.f32 %v156_v34, %v522_v22  ;;  %v176_v50 = vadd.f32 %v162_v33, %v520_v21 }
 0x114   :  { %v166_v35 = vpop.permute.xlu1 %165  ;;  %v160_v36 = vpop.permute.xlu0 %159 }
 0x115   :  { %v175_v45 = vadd.f32 %v160_v36, %v530_v24  ;;  %v178_v51 = vadd.f32 %v166_v35, %v528_v23 }
 0x118   :  { %v194_v37 = vpop.permute.xlu1 %193  ;;  %v164_v38 = vpop.permute.xlu0 %163 }
 0x119   :  { %v210_v41 = vadd.f32 %v194_v37, %v174_v39  ;;  %v177_v55 = vadd.f32 %v164_v38, %v538_v26 }
 0x11b   :  { %v278_v46 = vrot.slane %v210_v41, 2 }
 0x11c   :  { %v198_v42 = vpop.permute.xlu1 %197  ;;  %v192_v43 = vpop.permute.xlu0 %191 }
 0x11d   :  { %v209_v44 = vadd.f32 %v192_v43, %v173_v40  ;;  %v212_v56 = vadd.f32 %v198_v42, %v176_v50 }
 0x11f   :  { %v277_v47 = vrot.slane %v209_v44, 2  ;;  %v282_v0 = vrot.slane %v212_v56, 2 }
 0x120   :  { %v202_v48 = vpop.permute.xlu1 %201  ;;  %v196_v49 = vpop.permute.xlu0 %195 }
 0x121   :  { %v279_v52 = vsel %vm221_vm6, %v277_v47, %v278_v46  ;;  %v211_v53 = vadd.f32 %v196_v49, %v175_v45  ;;  %v214_v57 = vadd.f32 %v202_v48, %v178_v51 }
 0x122   :  { %v291_v54 = vsub.f32 %v209_v44, %v279_v52 }
 0x123   :  { %v280_v58 = vrot.slane %v211_v53, 2  ;;  %v285_v1 = vrot.slane %v214_v57, 2 }
 0x124   :  { %v299_v59 = vmul.f32 %v291_v54, %v291_v54  ;;  %v200_v60 = vpop.permute.xlu0 %199  ;;  %v134_v10 = vpop.permute.xlu1 %133 }
 0x125   :  { %v213_v61 = vadd.f32 %v200_v60, %v177_v55  ;;  %v281_v62 = vsel %vm221_vm6, %v278_v46, %v280_v58  ;;  %v150_v14 = vsub.f32 %v516_v20, %v134_v10 }
 0x126   :  { %307 = vrot.lane.b32.xlu0 %v299_v59, %s471_s26  ;;  %v292_v63 = vsub.f32 %v210_v41, %v281_v62 }
 0x127   :  { %v283_v2 = vrot.slane %v213_v61, 2  ;;  %v241_v17 = vadd.f32 %v150_v14, %v150_v14  ;;  %v223_v19 = vrot.slane %v150_v14, 2 }
 0x128   :  { %v300_v3 = vmul.f32 %v292_v63, %v292_v63  ;;  %v132_v11 = vpop.permute.xlu0 %131  ;;  %v138_v12 = vpop.permute.xlu1 %137 }
 0x129   :  { %v286_v4 = vsel %vm221_vm6, %v283_v2, %v285_v1  ;;  %v284_v5 = vsel %vm221_vm6, %v282_v0, %v283_v2  ;;  %v149_v13 = vsub.f32 %v522_v22, %v132_v11  ;;  %v152_v29 = vsub.f32 %v520_v21, %v138_v12 }
 0x12a   :  { %v294_v6 = vsub.f32 %v213_v61, %v286_v4  ;;  %309 = vrot.lane.b32.xlu1 %v300_v3, %s471_s26  ;;  %v293_v7 = vsub.f32 %v212_v56, %v284_v5  ;;  %v254_v31 = vrot.slane %v241_v17, 1 }
 0x12b   :  { %v240_v16 = vadd.f32 %v149_v13, %v149_v13  ;;  %v222_v18 = vrot.slane %v149_v13, 2  ;;  %v227_v35 = vrot.slane %v152_v29, 2  ;;  %v243_v36 = vadd.f32 %v152_v29, %v152_v29 }
 0x12c   :  { %v302_v8 = vmul.f32 %v294_v6, %v294_v6  ;;  %v301_v9 = vmul.f32 %v293_v7, %v293_v7  ;;  %v136_v15 = vpop.permute.xlu0 %135  ;;  %v142_v27 = vpop.permute.xlu1 %141 }
 0x12d   :  { %v151_v25 = vsub.f32 %v530_v24, %v136_v15  ;;  %v253_v30 = vrot.slane %v240_v16, 1  ;;  %v154_v32 = vsub.f32 %v528_v23, %v142_v27  ;;  %v224_v34 = vsel %vm221_vm6, %v222_v18, %v223_v19 }
 0x12e   :  { %313 = vrot.lane.b32.xlu1 %v302_v8, %s471_s26  ;;  %311 = vrot.lane.b32.xlu0 %v301_v9, %s471_s26  ;;  %v236_v24 = vadd.f32 %v224_v34, %v149_v13  ;;  %v258_v23 = vrot.slane %v243_v36, 1 }
 0x12f   :  { %v225_v33 = vrot.slane %v151_v25, 2  ;;  %v242_v22 = vadd.f32 %v151_v25, %v151_v25  ;;  %v230_v37 = vrot.slane %v154_v32, 2  ;;  %v245_v38 = vadd.f32 %v154_v32, %v154_v32 }
 0x130   :  { %v140_v28 = vpop.permute.xlu0 %139  ;;  %v255_v39 = vsel %vm252_vm7, %v253_v30, %v254_v31 }
 0x131   :  { %v153_v20 = vsub.f32 %v538_v26, %v140_v28  ;;  %v256_v40 = vrot.slane %v242_v22, 1  ;;  %v226_v42 = vsel %vm221_vm6, %v223_v19, %v225_v33  ;;  %v261_v43 = vrot.slane %v245_v38, 1 }
 0x132   :  { %v267_v44 = vadd.f32 %v255_v39, %v236_v24  ;;  %v237_v45 = vadd.f32 %v226_v42, %v150_v14 }
 0x133   :  { %v228_v21 = vrot.slane %v153_v20, 2  ;;  %v244_v41 = vadd.f32 %v153_v20, %v153_v20  ;;  %v257_v26 = vsel %vm252_vm7, %v254_v31, %v256_v40 }
 0x134   :  { %v295_v49 = vmul.f32 %v267_v44, %v267_v44  ;;  %v268_v50 = vadd.f32 %v257_v26, %v237_v45 }
 0x135   :  { %v259_v46 = vrot.slane %v244_v41, 1  ;;  %v231_v47 = vsel %vm221_vm6, %v228_v21, %v230_v37  ;;  %v229_v48 = vsel %vm221_vm6, %v227_v35, %v228_v21 }
 0x136   :  { %v239_v51 = vadd.f32 %v231_v47, %v153_v20  ;;  %v238_v52 = vadd.f32 %v229_v48, %v152_v29  ;;  %v296_v57 = vmul.f32 %v268_v50, %v268_v50 }
 0x137   :  { %v262_v54 = vsel %vm252_vm7, %v259_v46, %v261_v43  ;;  %v260_v55 = vsel %vm252_vm7, %v258_v23, %v259_v46 }
 0x138   :  { %v270_v58 = vadd.f32 %v262_v54, %v239_v51  ;;  %v269_v59 = vadd.f32 %v260_v55, %v238_v52 }
 0x13a   :  { %v298_v62 = vmul.f32 %v270_v58, %v270_v58  ;;  %v297_v63 = vmul.f32 %v269_v59, %v269_v59 }
 0x198   :  { %v308_v53 = vpop.permute.xlu0 %307 }
 0x199   :  { %v319_v56 = vadd.f32 %v308_v53, %v295_v49 }
 0x19b   :  { %408 = vrsqrt.f32 %v319_v56  ;;  %vm325_vm8 = vcmp.eq.f32.partialorder %v319_v56, inf  ;;  %v328_v6 = vand.u32 2147483648, %v319_v56  ;;  %vm327_vm9 = vcmp.eq.f32.partialorder %v319_v56, 0.0 }
 0x19c   :  { %v310_v60 = vpop.permute.xlu1 %309 }
 0x19d   :  { %v320_v61 = vadd.f32 %v310_v60, %v296_v57 }
 0x19f   :  { %410 = vrsqrt.f32 %v320_v61  ;;  %vm332_vm10 = vcmp.eq.f32.partialorder %v320_v61, inf  ;;  %v335_v11 = vand.u32 2147483648, %v320_v61  ;;  %vm334_vm11 = vcmp.eq.f32.partialorder %v320_v61, 0.0 }
 0x1a0   :  { %v314_v0 = vpop.permute.xlu1 %313  ;;  %v312_v1 = vpop.permute.xlu0 %311 }
 0x1a1   :  { %v322_v2 = vadd.f32 %v314_v0, %v298_v62  ;;  %v321_v3 = vadd.f32 %v312_v1, %v297_v63 }
 0x1a3   :  { %412 = vrsqrt.f32 %v322_v2  ;;  %vm346_vm12 = vcmp.eq.f32.partialorder %v322_v2, inf  ;;  %v349_v17 = vand.u32 2147483648, %v322_v2  ;;  %vm348_vm13 = vcmp.eq.f32.partialorder %v322_v2, 0.0 }
 0x1a4   :  { %414 = vrsqrt.f32 %v321_v3  ;;  %vm339_vm14 = vcmp.eq.f32.partialorder %v321_v3, inf  ;;  %v342_v25 = vand.u32 2147483648, %v321_v3  ;;  %vm341_vm15 = vcmp.eq.f32.partialorder %v321_v3, 0.0 }
 0x1a5   :  { %v409_v4 = vpop.eup %408 }
 0x1a6   :  { %v324_v5 = vmul.f32 %v409_v4, %v319_v56 }
 0x1a8   :  { %v326_v7 = vsel %vm325_vm8, %v319_v56, %v324_v5 }
 0x1a9   :  { %v411_v8 = vpop.eup %410  ;;  %v329_v9 = vsel %vm327_vm9, %v328_v6, %v326_v7 }
 0x1aa   :  { %355 = vrot.lane.b32.xlu0 %v329_v9, %s469_s0  ;;  %v331_v10 = vmul.f32 %v411_v8, %v320_v61 }
 0x1ac   :  { %v333_v12 = vsel %vm332_vm10, %v320_v61, %v331_v10 }
 0x1ad   :  { %v413_v13 = vpop.eup %412  ;;  %v336_v14 = vsel %vm334_vm11, %v335_v11, %v333_v12 }
 0x1ae   :  { %v415_v15 = vpop.eup %414  ;;  %357 = vrot.lane.b32.xlu1 %v336_v14, %s469_s0  ;;  %v345_v16 = vmul.f32 %v413_v13, %v322_v2 }
 0x1af   :  { %v338_v18 = vmul.f32 %v415_v15, %v321_v3 }
 0x1b0   :  { %v347_v19 = vsel %vm346_vm12, %v322_v2, %v345_v16 }
 0x1b1   :  { %v350_v27 = vsel %vm348_vm13, %v349_v17, %v347_v19  ;;  %v340_v28 = vsel %vm339_vm14, %v321_v3, %v338_v18 }
 0x1b2   :  { %361 = vrot.lane.b32.xlu1 %v350_v27, %s469_s0  ;;  %v343_v29 = vsel %vm341_vm15, %v342_v25, %v340_v28 }
 0x1b3   :  { %359 = vrot.lane.b32.xlu0 %v343_v29, %s469_s0 }
 0x21c   :  { %v356_v30 = vpop.permute.xlu0 %355 }
 0x21d   :  { %368 = vst.msk [vmem:[#allocation6] sm:$0xff] %vm367_vm0, %v356_v30 }
 0x220   :  { %v358_v31 = vpop.permute.xlu1 %357 }
 0x221   :  { %369 = vst.msk [vmem:[#allocation6 + $0x8] sm:$0xff] %vm367_vm0, %v358_v31 }
 0x224   :  { %v362_v32 = vpop.permute.xlu1 %361 }
 0x225   :  { %371 = vst.msk [vmem:[#allocation6 + $0x18] sm:$0xff] %vm367_vm0, %v362_v32  ;;  %v360_v33 = vpop.permute.xlu0 %359 }
 0x226   :  { %370 = vst.msk [vmem:[#allocation6 + $0x10] sm:$0xff] %vm367_vm0, %v360_v33 }
 0x227   :  { %449 = shalt.err (!%p446_p12)
}
 0x228   :  { %s450_s5 = scalar_lea.hbm %s614_s3, 512 }
 0x229   :  { %p451_p13 = scmp.ne.s32.totalorder %s614_s3, %s450_s5  ;;  %p454_p0 = scmp.lt.u32.totalorder %s450_s5, %s614_s3 }
 0x22b   :  { %p456_p1 = pnand %p454_p0, %p451_p13 }
 0x22d   :  { %459 = shalt.err (!%p456_p1)
}
 0x22e   :  { %383 = dma.vmem_to_hbm [thread:$0]  %s378_s28, 512, %s614_s3, [#allocation5], %s465_s20, %s465_s20, %s466_s21  }
 0x22f   :  { %462 = dma.done.wait [#allocation5], 512  }
 0x230   :  { %463 = vsyncadd [#allocation5], 4294966784 }
 0x231   :  { %387 = vsyncpa [#allocation4], 1 }
 0x232   :  { %388 = vsyncpa [#allocation5], 1 }

</bundles_post_ra>
